<compile_context>
chip_gen: v7x
topology: tpu7x:2x2x1
jax: 0.10.0
libtpu: 0.0.40
codegen_flags: <defaults>
</compile_context>

<pallas_src>
import jax
import jax.numpy as jnp
from jax import lax
from jax.experimental import pallas as pl
from jax.experimental.pallas import tpu as pltpu

OUT_FEATURES = 4


def _linear_kernel(x_ref, w_ref, b_ref, o_ref):
    # x_ref: (TB, in)   w_ref: (out, in)   b_ref: (1, out)   o_ref: (TB, out)
    acc = lax.dot_general(
        x_ref[...], w_ref[...],
        dimension_numbers=(((1,), (1,)), ((), ())),  # contract x dim-1 w/ w dim-1
        preferred_element_type=jnp.float32,
    )
    o_ref[...] = (acc + b_ref[...]).astype(o_ref.dtype)


def _round_up(n, m):
    return ((n + m - 1) // m) * m


def client_model_forward(x, weight, bias, *, tile_b=None):
    """x: (B, input_size); weight: (out, input_size); bias: (out,) -> (B, out) f32."""
    B, in_features = x.shape
    out_features = weight.shape[0]
    itemsize = 4  # float32

    # --- pick a batch tile ---------------------------------------------------
    # Aim for ~512 rows (measured ~85% of HBM roofline), but cap so the
    # double-buffered x stream stays <= ~8 MiB: safe under v5e's 16 MiB scoped
    # VMEM default and trivially under v7x's 64 MiB physical VMEM.
    if tile_b is None:
        x_budget_bytes = 8 * 1024 * 1024
        max_tb = max(8, x_budget_bytes // (2 * in_features * itemsize))
        tile_b = int(min(512, max_tb))
    tile_b = max(8, (tile_b // 8) * 8)            # sublane (8) aligned
    tile_b = min(tile_b, _round_up(B, 8))         # don't over-pad tiny batches

    # --- pad batch to a multiple of the tile ---------------------------------
    padded_b = _round_up(B, tile_b)
    x_p = x if padded_b == B else jnp.pad(x, ((0, padded_b - B), (0, 0)))
    b2 = bias.reshape(1, out_features)

    grid_b = padded_b // tile_b

    # --- explicit VMEM budget (inputs/outputs double-buffered + residents) ---
    vmem_bytes = (2 * tile_b * in_features * itemsize      # x stream
                  + 2 * tile_b * out_features * itemsize   # out stream
                  + out_features * in_features * itemsize  # weight (resident)
                  + out_features * itemsize                # bias (resident)
                  + (2 << 20))                             # headroom
    vmem_limit = int(min(max(vmem_bytes, 4 << 20), 64 << 20))

    y = pl.pallas_call(
        _linear_kernel,
        out_shape=jax.ShapeDtypeStruct((padded_b, out_features), jnp.float32),
        grid=(grid_b,),
        in_specs=[
            pl.BlockSpec((tile_b, in_features), lambda i: (i, 0)),          # x tile
            pl.BlockSpec((out_features, in_features), lambda i: (0, 0)),    # weight
            pl.BlockSpec((1, out_features), lambda i: (0, 0)),              # bias
        ],
        out_specs=pl.BlockSpec((tile_b, out_features), lambda i: (i, 0)),
        compiler_params=pltpu.CompilerParams(
            dimension_semantics=("parallel",),   # batch tiles are independent
            vmem_limit_bytes=vmem_limit,
        ),
    )(x_p, weight, b2)

    return y[:B] if padded_b != B else y


def init_params(key, input_size, out_features=OUT_FEATURES):
    # Deterministic, PyTorch-Linear-style init: U(-1/sqrt(in), 1/sqrt(in)).
    kw, kb = jax.random.split(key)
    bound = 1.0 / jnp.sqrt(jnp.float32(input_size))
    weight = jax.random.uniform(
        kw, (out_features, input_size), jnp.float32, -bound, bound)
    bias = jax.random.uniform(
        kb, (out_features,), jnp.float32, -bound, bound)
    return weight, bias


if __name__ == "__main__":
    key = jax.random.PRNGKey(0)
    k_x, k_p = jax.random.split(key)

    batch, input_size = 8, 32
    x = jax.random.normal(k_x, (batch, input_size), jnp.float32)
    weight, bias = init_params(k_p, input_size, out_features=OUT_FEATURES)

    y = client_model_forward(x, weight, bias)
    jax.block_until_ready(y)

    # Sanity check against plain JAX reference.
    y_ref = x @ weight.T + bias
    assert y.shape == (batch, OUT_FEATURES)
    assert jnp.allclose(y, y_ref, atol=1e-5, rtol=1e-5)

    # Also exercise a batch that is not a multiple of the tile / of 8.
    batch2 = 37
    x2 = jax.random.normal(jax.random.PRNGKey(1), (batch2, input_size), jnp.float32)
    y2 = client_model_forward(x2, weight, bias)
    jax.block_until_ready(y2)
    assert jnp.allclose(y2, x2 @ weight.T + bias, atol=1e-5, rtol=1e-5)

    print("KERNEL_OK")
</pallas_src>

<mosaic_0001>
module attributes {stable_mosaic.version = 11 : i64} {
  func.func @_linear_kernel(%arg0: i32, %arg1: memref<8x32xf32, #tpu.memory_space<vmem>>, %arg2: memref<4x32xf32, #tpu.memory_space<vmem>>, %arg3: memref<1x4xf32, #tpu.memory_space<vmem>>, %arg4: memref<8x4xf32, #tpu.memory_space<vmem>>) attributes {dimension_semantics = [#tpu.dimension_semantics<parallel>], iteration_bounds = array<i64: 1>, scalar_prefetch = 0 : i64, scratch_operands = 0 : i64, tpu.core_type = #tpu.core_type<tc>, window_params = [{transform_indices = @transform_0, window_bounds = array<i64: 8, 32>}, {pipeline_mode = #tpu.pipeline_mode<synchronous>, transform_indices = @transform_1, window_bounds = array<i64: 4, 32>}, {pipeline_mode = #tpu.pipeline_mode<synchronous>, transform_indices = @transform_2, window_bounds = array<i64: 1, 4>}, {transform_indices = @transform_3, window_bounds = array<i64: 8, 4>}]} {
    %c0 = arith.constant 0 : index
    %c0_0 = arith.constant 0 : index
    %0 = vector.load %arg1[%c0, %c0_0] : memref<8x32xf32, #tpu.memory_space<vmem>>, vector<8x32xf32>
    %c0_1 = arith.constant 0 : index
    %c0_2 = arith.constant 0 : index
    %1 = vector.load %arg2[%c0_1, %c0_2] : memref<4x32xf32, #tpu.memory_space<vmem>>, vector<4x32xf32>
    %cst = arith.constant dense<0.000000e+00> : vector<8x4xf32>
    %2 = tpu.matmul %0, %1, %cst {dimension_numbers = #tpu.dot_dimension_numbers<[1], [1], [0], [0], [0, 0, 1, 0], [], []>} : vector<8x32xf32>, vector<4x32xf32>, vector<8x4xf32> -> vector<8x4xf32>
    %c0_3 = arith.constant 0 : index
    %c0_4 = arith.constant 0 : index
    %3 = vector.load %arg3[%c0_3, %c0_4] : memref<1x4xf32, #tpu.memory_space<vmem>>, vector<1x4xf32>
    %4 = vector.broadcast %3 : vector<1x4xf32> to vector<8x4xf32>
    %5 = arith.addf %2, %4 : vector<8x4xf32>
    %c0_5 = arith.constant 0 : index
    %c0_6 = arith.constant 0 : index
    %6 = vector.load %arg4[%c0_5, %c0_6] : memref<8x4xf32, #tpu.memory_space<vmem>>, vector<8x4xf32>
    tpu.vector_store %arg4[%c0_5, %c0_6], %5 {strides = array<i32>} : memref<8x4xf32, #tpu.memory_space<vmem>>, vector<8x4xf32>,
    return
  }
  func.func @transform_0(%arg0: i32) -> (i32, i32) {
    %c0_i32 = arith.constant 0 : i32
    %c0_i32_0 = arith.constant 0 : i32
    return %arg0, %c0_i32 : i32, i32
  }
  func.func @transform_1(%arg0: i32) -> (i32, i32) {
    %c0_i32 = arith.constant 0 : i32
    %c0_i32_0 = arith.constant 0 : i32
    %c0_i32_1 = arith.constant 0 : i32
    return %c0_i32, %c0_i32_0 : i32, i32
  }
  func.func @transform_2(%arg0: i32) -> (i32, i32) {
    %c0_i32 = arith.constant 0 : i32
    %c0_i32_0 = arith.constant 0 : i32
    %c0_i32_1 = arith.constant 0 : i32
    return %c0_i32, %c0_i32_0 : i32, i32
  }
  func.func @transform_3(%arg0: i32) -> (i32, i32) {
    %c0_i32 = arith.constant 0 : i32
    %c0_i32_0 = arith.constant 0 : i32
    return %arg0, %c0_i32 : i32, i32
  }
}

</mosaic_0001>

<bundles_post_ra>
// kernel: tpu_custom_call.1
= control target key start
LH: loop header
LB: loop body
LE: loop exit
PB: predicated region body
PF: predicated region fallthrough
CT: control target
= control target key end

     0   :  { %8 = vsyncpa [#allocation3], 0  ;;  %s248_s0 = inlined_call_operand.hbm [shape: f32[8,32], index: 0, kind: input, shape index: {}]   ;;  %s249_s1 = inlined_call_operand.hbm [shape: f32[4,32], index: 1, kind: input, shape index: {}]   ;;  %s250_s2 = inlined_call_operand.vmem [shape: f32[1,4], index: 2, kind: input, shape index: {}]   ;;  %s251_s3 = inlined_call_operand.vmem [shape: f32[8,4], index: 3, kind: output, shape index: {}]  }
   0x1   :  { %9 = vsyncpa [#allocation5], 0  ;;  %s194_s12 = smov [#allocation2]   ;;  %s195_s14 = smov [#allocation4]  }
   0x2   :  { %s16_s13 = sshll.u32 %s194_s12, 4  ;;  %s26_s15 = sshll.u32 %s195_s14, 4  ;;  %s17_s13 = int_to_ptr.vmem [resolvable:$true] %s16_s13  ;;  %s27_s15 = int_to_ptr.vmem [resolvable:$true] %s26_s15 }
   0x3   :  { %s146_s18 = scalar_lea.hbm %s248_s0, 128 }
   0x4   :  { %p147_p0 = scmp.ne.s32.totalorder %s248_s0, %s146_s18  ;;  %p150_p1 = scmp.lt.u32.totalorder %s146_s18, %s248_s0 }
   0x6   :  { %p152_p2 = pnand %p150_p1, %p147_p0 }
   0x8   :  { %155 = shalt.err (!%p152_p2)
}
   0x9   :  { %s156_s23 = scalar_lea.vmem %s17_s13, 128  ;;  %p161_p4 = scmp.lt.s32.totalorder %s17_s13, %s17_s13 }
   0xa   :  { %p157_p3 = scmp.ne.s32.totalorder %s17_s13, %s156_s23  ;;  %p162_p5 = scmp.lt.s32.totalorder %s156_s23, %s156_s23 }
   0xc   :  { %p163_p6 = por %p162_p5, %p161_p4 }
   0xe   :  { %p164_p7 = pnand %p163_p6, %p157_p3 }
  0x10   :  { %167 = shalt.err (!%p164_p7)
}
  0x11   :  { %19 = dma.hbm_to_vmem [thread:$0]  %s248_s0, 128, %s17_s13, [#allocation3]  }
  0x12   :  { %s168_s28 = scalar_lea.hbm %s249_s1, 64 }
  0x13   :  { %p169_p8 = scmp.ne.s32.totalorder %s249_s1, %s168_s28  ;;  %p172_p9 = scmp.lt.u32.totalorder %s168_s28, %s249_s1 }
  0x15   :  { %p174_p10 = pnand %p172_p9, %p169_p8 }
  0x17   :  { %177 = shalt.err (!%p174_p10)
}
  0x18   :  { %s178_s6 = scalar_lea.vmem %s27_s15, 64  ;;  %p183_p12 = scmp.lt.s32.totalorder %s27_s15, %s27_s15 }
  0x19   :  { %p179_p11 = scmp.ne.s32.totalorder %s27_s15, %s178_s6  ;;  %p184_p13 = scmp.lt.s32.totalorder %s178_s6, %s178_s6 }
  0x1b   :  { %p185_p0 = por %p184_p13, %p183_p12 }
  0x1d   :  { %p186_p1 = pnand %p185_p0, %p179_p11 }
  0x1f   :  { %189 = shalt.err (!%p186_p1)
}
  0x20   :  { %29 = dma.hbm_to_vmem [thread:$0]  %s249_s1, 64, %s27_s15, [#allocation5]  }
  0x21   :  { %190 = dma.done.wait [#allocation3], 128  }
  0x22   :  { %191 = vsyncadd [#allocation3], 4294967168 }
  0x23   :  { %192 = dma.done.wait [#allocation5], 64  }
  0x24   :  { %193 = vsyncadd [#allocation5], 4294967232  ;;  %v196_v0 = vmov 0.0   ;;  %vm197_vm0 = vmmov 0   ;;  %vm47_vm1 = vcmask 261120   ;;  %v38_v2 = vld [vmem:[#allocation2] sm:$0xff] }
  0x25   :  { %137 = vmatprep.subr.mxu0 %v196_v0  ;;  %139 = vmatprep.mubr.msk.f32.mxu0 %vm197_vm0, %v196_v0  ;;  %v39_v1 = vld [vmem:[#allocation4] sm:$0xf]  ;;  %v132_v3 = vld [vmem:[%s250_s2] ss:$0 sm:$0xff]  ;;  %vm124_vm2 = vcmask 31744  }
  0x26   :  { %138 = vmatpush3.xpose.msk.msra.mxu0 %vm47_vm1, %v39_v1 }
  0x29   :  { %140 = vmatmul.mubr.msk.f32.vlgmr.msra.gmra.mrb[0].mxu0 %vm47_vm1, %v38_v2 }
  0xfc   :  { %v120_v4 = vpop.f32.mrb[0].mxu0 }
  0xfd   :  { %v121_v5 = vadd.f32 %v132_v3, %v120_v4  ;;  %v141_v6 = vpop.f32.mrb[1].mxu0 }
  0xff   :  { %125 = vst.msk [vmem:[%s251_s3] sm:$0xff] %vm124_vm2, %v121_v5 }
 0x100   :  { %130 = vsyncpa [#allocation3], 1 }
 0x101   :  { %131 = vsyncpa [#allocation5], 1 }

</bundles_post_ra>
